<compile_context>
chip_gen: v5e
topology: v5e:2x2
jax: 0.10.0
libtpu: 0.0.40
codegen_flags: <defaults>
</compile_context>

<pallas_src>
import functools
import math

import jax
import jax.numpy as jnp
from jax.experimental import pallas as pl
from jax.experimental.pallas import tpu as pltpu


def _cdiv(a, b):
    return -(-a // b)


def _round_up(a, b):
    return _cdiv(a, b) * b


def _xla_nearest_repeat(x, k):
    return jnp.repeat(x, k, axis=-1)


def _vmem_capacity_bytes():
    try:
        return int(pltpu.get_tpu_info().vmem_capacity_bytes)
    except Exception:
        pass
    kind = ""
    try:
        kind = jax.devices()[0].device_kind.lower()
    except Exception:
        pass
    if "v7" in kind:
        return 64 * 1024 * 1024
    return 128 * 1024 * 1024


def _mxu_lane_target(itemsize):
    """Preferred contraction width per TPU generation (keeps the gather-as-matmul
    safely HBM-bound even at HIGHEST precision for f32)."""
    kind = ""
    try:
        kind = jax.devices()[0].device_kind.lower()
    except Exception:
        pass
    if "v5" in kind:
        return 128                               # 128x128 MXUs
    if "v6" in kind:
        return 256                               # 256x256 MXU, still HBM-bound
    if "v7" in kind:
        return 128 if itemsize == 4 else 256     # 3.2 TB/s HBM: keep f32 multi-pass small
    return 128 if itemsize == 4 else 256


def _upsample_kernel(x_ref, o_ref, *, k):
    """out[r, q] = x[r, q // k] via an exact 0/1 selection matmul on the MXU."""
    w_in = x_ref.shape[-1]
    w_out = o_ref.shape[-1]
    x = x_ref[...]
    # U[p, q] = 1 iff q // k == p, built in-kernel (cheap VPU iota + compare):
    # no HBM read, no double-buffered VMEM input for a constant.
    rid = jax.lax.broadcasted_iota(jnp.int32, (w_in, w_out), 0)
    cid = jax.lax.broadcasted_iota(jnp.int32, (w_in, w_out), 1)
    u = ((cid >= rid * k) & (cid < (rid + 1) * k)).astype(x.dtype)
    # HIGHEST precision keeps the f32 path exact (default TPU matmul precision
    # rounds f32 operands to bf16, which would break the "exact gather").
    o_ref[...] = jnp.dot(
        x, u,
        precision=jax.lax.Precision.HIGHEST,
        preferred_element_type=jnp.float32,
    ).astype(o_ref.dtype)


def graph_upsample_pallas(x, scale_factor=2, *, min_pallas_bytes=1 << 20):
    """Nearest-neighbour upsample along the last axis.

    x: (bs, features, node_n, seq_len) -> (bs, features, node_n, seq_len*scale).
    Matches F.interpolate(x, (node_n, seq_len*scale), mode='nearest').
    """
    if x.ndim != 4:
        raise ValueError(f"expected 4D input (bs, feat, node, seq), got {x.shape}")
    k = int(scale_factor)
    if k != scale_factor or k < 1:
        # TODO(synk): fractional scale factors (floor(w/scale) indexing) are not
        # implemented; the original module only uses integer scales.
        raise ValueError(f"scale_factor must be a positive integer, got {scale_factor!r}")
    if k == 1:
        return x

    bs, features, node_n, seq_len = x.shape
    out_len = seq_len * k
    rows = bs * features * node_n
    dtype = x.dtype
    itemsize = jnp.dtype(dtype).itemsize

    if dtype not in (jnp.float32, jnp.bfloat16):
        # TODO(synk): non-f32/bf16 dtypes fall back to the XLA nearest-repeat.
        return _xla_nearest_repeat(x, k)

    # Tiny inputs: pallas_call fixed cost (~us) dwarfs the copy.
    if rows * out_len * itemsize < min_pallas_bytes:
        return _xla_nearest_repeat(x, k)

    # ---- 1) Group G rows per super-row so the flattened output lane width is a
    #         multiple of 128 (unmasked, dense stores).  Prefer a divisor of
    #         `rows`; otherwise pad the row count rather than degrade density.
    LANE_TARGET = 512
    LANE_CAP = 2048
    pad_rows = 0
    if out_len >= LANE_TARGET:
        G = 1  # wide enough already; any non-128 tail is a negligible fraction
    else:
        g0 = 128 // math.gcd(128, out_len)  # smallest G giving lane_out % 128 == 0
        cands = []
        g = g0
        while g * out_len <= LANE_CAP:
            cands.append(g)
            g += g0
        if not cands:
            # TODO(synk): no 128-dense grouping fits the lane cap for this
            # seq_len/scale combination -> XLA nearest-repeat fallback.
            return _xla_nearest_repeat(x, k)
        G = None
        for g in cands:                      # smallest first: keep rows2 large
            if rows % g == 0 and g * out_len >= LANE_TARGET:
                G = g
                break
        if G is None:
            for g in cands:                  # largest dense divisor below target
                if rows % g == 0:
                    G = g
        if G is None:
            # No divisor at all: pad rows (one extra pass) instead of masked
            # narrow stores (measured ~4x penalty).
            for g in cands:
                if g * out_len >= LANE_TARGET:
                    G = g
                    break
            if G is None:
                G = cands[-1]
            pad_rows = _round_up(rows, G) - rows

    rows_p = rows + pad_rows
    rows2 = rows_p // G
    lane_in = G * seq_len
    lane_out = G * out_len

    # ---- 2) Lane tiling: contraction width per MXU pass (generation aware).
    w_target = _mxu_lane_target(itemsize)
    if lane_in <= w_target:
        w_in = lane_in
    elif lane_in % w_target == 0:
        w_in = w_target
    elif lane_in % 128 == 0:
        w_in = 128
    else:
        w_in = lane_in                      # full extent is always a legal block
    w_out = w_in * k
    num_lane_tiles = lane_in // w_in

    # ---- 3) Row tiling from a generation-aware VMEM budget; cdiv grid so
    #         awkward row counts never collapse the tile size.
    vmem_cap = _vmem_capacity_bytes()
    budget = (vmem_cap * 2) // 5            # ~51 MiB on 128 MiB chips, ~25 MiB on v7x
    vmem_limit = (vmem_cap * 3) // 4        # ~96 MiB / ~48 MiB scoped limit
    sub = 8 if itemsize == 4 else 16        # sublane packing multiple
    per_row = 2 * (w_in + w_out) * itemsize          # double-buffered in + out blocks
    u_bytes = 2 * w_in * w_out * 4                   # in-kernel U intermediates
    budget_rows = max(sub, (budget - u_bytes) // per_row)

    if budget_rows >= rows2:
        tile_rows = rows2
        if rows2 >= 2 * sub:                # give both v7x TensorCores a tile
            half = _round_up(_cdiv(rows2, 2), sub)
            if half < rows2:
                tile_rows = half
    else:
        tile_rows = (budget_rows // sub) * sub
        n_tiles = _cdiv(rows2, tile_rows)
        if n_tiles > 1 and n_tiles % 2 == 1:  # prefer an even tile count (dual TC)
            t2 = _round_up(_cdiv(rows2, n_tiles + 1), sub)
            if t2 >= sub and _cdiv(rows2, t2) % 2 == 0:
                tile_rows = t2
    num_row_tiles = _cdiv(rows2, tile_rows)

    # ---- 4) Flatten (free reshape of the contiguous buffer), pad if needed.
    x2 = x.reshape(rows, seq_len)
    if pad_rows:
        x2 = jnp.pad(x2, ((0, pad_rows), (0, 0)))
    x2 = x2.reshape(rows2, lane_in)

    kernel = functools.partial(_upsample_kernel, k=k)
    out2 = pl.pallas_call(
        kernel,
        out_shape=jax.ShapeDtypeStruct((rows2, lane_out), dtype),
        grid_spec=pltpu.PrefetchScalarGridSpec(
            num_scalar_prefetch=0,
            grid=(num_row_tiles, num_lane_tiles),
            in_specs=[pl.BlockSpec((tile_rows, w_in), lambda i, j: (i, j))],
            out_specs=pl.BlockSpec((tile_rows, w_out), lambda i, j: (i, j)),
        ),
        compiler_params=pltpu.CompilerParams(
            dimension_semantics=("parallel", "parallel"),
            vmem_limit_bytes=int(vmem_limit),
        ),
    )(x2)

    out = out2.reshape(rows_p, out_len)
    if pad_rows:
        out = out[:rows]
    return out.reshape(bs, features, node_n, out_len)


def _reference(x, scale_factor=2):
    # F.interpolate(..., mode='nearest') to (H, W*scale): out[..., w] = x[..., w//scale]
    return jnp.repeat(x, scale_factor, axis=-1)


if __name__ == "__main__":
    base_key = jax.random.PRNGKey(0)

    # (shape, scale) cases: canonical small shape, multi-row-tile shape,
    # awkward factors (non-multiple-of-8 rows2), row-padding path, scale=3.
    cases = [
        ((2, 4, 16, 16), 2),
        ((4, 8, 36, 40), 2),
        ((3, 4, 14, 24), 2),
        ((1, 1, 7, 20), 2),
        ((2, 4, 16, 16), 3),
    ]
    key = base_key
    for shape, scale in cases:
        key, sub_key = jax.random.split(key)
        x = jax.random.normal(sub_key, shape, dtype=jnp.float32)
        # min_pallas_bytes=0 forces the Pallas kernel even at these small sizes.
        out = graph_upsample_pallas(x, scale_factor=scale, min_pallas_bytes=0)
        out = jax.block_until_ready(out)
        ref = _reference(x, scale_factor=scale)
        assert out.shape == ref.shape, (out.shape, ref.shape)
        assert jnp.allclose(out, ref, atol=1e-6, rtol=1e-6), f"mismatch for {shape}, k={scale}"

    # bf16 path through the kernel.
    xb = jax.random.normal(jax.random.PRNGKey(1), (2, 4, 16, 16), dtype=jnp.bfloat16)
    ob = jax.block_until_ready(graph_upsample_pallas(xb, 2, min_pallas_bytes=0))
    assert jnp.allclose(ob.astype(jnp.float32), _reference(xb, 2).astype(jnp.float32),
                        atol=1e-2, rtol=1e-2)

    # Default small-input dispatch (XLA path) still matches.
    xs = jax.random.normal(base_key, (2, 4, 16, 16), dtype=jnp.float32)
    os_ = jax.block_until_ready(graph_upsample_pallas(xs, 2))
    assert jnp.allclose(os_, _reference(xs, 2), atol=1e-6, rtol=1e-6)

    print("KERNEL_OK")
</pallas_src>

<mosaic_0001>
module attributes {stable_mosaic.version = 11 : i64} {
  func.func @_upsample_kernel(%arg0: i32, %arg1: i32, %arg2: memref<8x128xf32, #tpu.memory_space<vmem>>, %arg3: memref<8x256xf32, #tpu.memory_space<vmem>>) attributes {dimension_semantics = [#tpu.dimension_semantics<parallel>, #tpu.dimension_semantics<parallel>], iteration_bounds = array<i64: 1, 2>, scalar_prefetch = 0 : i64, scratch_operands = 0 : i64, tpu.core_type = #tpu.core_type<tc>, window_params = [{transform_indices = @transform_0, window_bounds = array<i64: 8, 128>}, {transform_indices = @transform_1, window_bounds = array<i64: 8, 256>}]} {
    %c0 = arith.constant 0 : index
    %c0_0 = arith.constant 0 : index
    %0 = vector.load %arg2[%c0, %c0_0] : memref<8x128xf32, #tpu.memory_space<vmem>>, vector<8x128xf32>
    %1 = tpu.iota {dimensions = array<i32: 0>} : vector<128x256xi32>
    %2 = tpu.iota {dimensions = array<i32: 1>} : vector<128x256xi32>
    %c2_i32 = arith.constant 2 : i32
    %3 = vector.broadcast %c2_i32 : i32 to vector<128x256xi32>
    %4 = arith.muli %1, %3 : vector<128x256xi32>
    %5 = arith.cmpi sge, %2, %4 : vector<128x256xi32>
    %c1_i32 = arith.constant 1 : i32
    %6 = vector.broadcast %c1_i32 : i32 to vector<128x256xi32>
    %7 = arith.addi %1, %6 : vector<128x256xi32>
    %c2_i32_1 = arith.constant 2 : i32
    %8 = vector.broadcast %c2_i32_1 : i32 to vector<128x256xi32>
    %9 = arith.muli %7, %8 : vector<128x256xi32>
    %10 = arith.cmpi slt, %2, %9 : vector<128x256xi32>
    %11 = arith.andi %5, %10 : vector<128x256xi1>
    %12 = arith.extui %11 : vector<128x256xi1> to vector<128x256xi32>
    %13 = arith.sitofp %12 : vector<128x256xi32> to vector<128x256xf32>
    %cst = arith.constant dense<0.000000e+00> : vector<8x256xf32>
    %14 = tpu.matmul %0, %13, %cst {dimension_numbers = #tpu.dot_dimension_numbers<[1], [0], [0], [1], [0, 0, 1, 1], [], []>, precision = #tpu.contract_precision<fp32>} : vector<8x128xf32>, vector<128x256xf32>, vector<8x256xf32> -> vector<8x256xf32>
    %c0_2 = arith.constant 0 : index
    %c0_3 = arith.constant 0 : index
    %15 = vector.load %arg3[%c0_2, %c0_3] : memref<8x256xf32, #tpu.memory_space<vmem>>, vector<8x256xf32>
    tpu.vector_store %arg3[%c0_2, %c0_3], %14 {strides = array<i32>} : memref<8x256xf32, #tpu.memory_space<vmem>>, vector<8x256xf32>,
    return
  }
  func.func @transform_0(%arg0: i32, %arg1: i32) -> (i32, i32) {
    %c0_i32 = arith.constant 0 : i32
    return %arg0, %arg1 : i32, i32
  }
  func.func @transform_1(%arg0: i32, %arg1: i32) -> (i32, i32) {
    %c0_i32 = arith.constant 0 : i32
    return %arg0, %arg1 : i32, i32
  }
}

</mosaic_0001>

<bundles_post_ra>
// kernel: tpu_custom_call.1
= control target key start
LH: loop header
LB: loop body
LE: loop exit
PB: predicated region body
PF: predicated region fallthrough
CT: control target
= control target key end

     0   :  { %6 = vsyncpa [#allocation3], 0  ;;  %s2935_s0 = inlined_call_operand.hbm [shape: f32[8,256], index: 0, kind: input, shape index: {}]   ;;  %s2936_s1 = inlined_call_operand.hbm [shape: f32[8,512], index: 1, kind: output, shape index: {}]  }
   0x1   :  { %8 = vsyncpa [#allocation3 + $0x1], 0 }
   0x2   :  { %9 = vsyncpa [#allocation4], 0 }
   0x3   :  { %11 = vsyncpa [#allocation4 + $0x1], 0  ;;  %s1501_s6 = smov 0   ;;  %s1503_s7 = smov 0  }
   0x4   :  { %s1505_s8 = smov 0   ;;  %s1507_s9 = smov 0  }
   0x5   :  { %s1509_s10 = smov 0   ;;  %s1511_s11 = smov 0  }
   0x6 LB: > { %s1168_s12 = sadd.s32 4294967295, %s1487_s11   ;;  %s1169_s13 = sadd.s32 4294967294, %s1487_s11   ;;  %s1487_s11 = sphi %s1511_s11, %s17_s11   ;;  %s1483_s10 = sphi %s1509_s10, %s3235_s10   ;;  %s1479_s9 = sphi %s1507_s9, %s3234_s9   ;;  %s1475_s8 = sphi %s1505_s8, %s3233_s8   ;;  %s1471_s7 = sphi %s1503_s7, %s3232_s7   ;;  %s1467_s6 = sphi %s1501_s6, %s3231_s6  }
   0x7   : > { %s26_s14 = sadd.s32 1, %s1483_s10  ;;  %s38_s15 = sadd.s32 1, %s1475_s8 }
   0x8   : > { %p27_p0 = scmp.ge.s32.totalorder %s26_s14, 2  ;;  %p45_p1 = scmp.ne.s32.totalorder %s1475_s8, %s1471_s7 }
   0x9   : > { %p46_p2 = scmp.eq.s32.totalorder %s1487_s11, 0  ;;  %p51_p3 = scmp.ne.s32.totalorder %s1471_s7, %s1467_s6 }
   0xa   : > { %s3237_s14 = smov (%p27_p0, %s26_s14), 0  ;;  %p52_p5 = scmp.eq.s32.totalorder %s1168_s12, 0 }
   0xb   : > { %p1542_p4 = por %p46_p2, %p45_p1  ;;  %s34_s17 = ssub.s32 %s1483_s10, %s3237_s14 }
   0xc   : > { %p77_p6 = scmp.eq.s32.totalorder %s1168_s12, 1  ;;  %p36_p7 = scmp.eq.s32.totalorder %s34_s17, 0 }
   0xd   : > { %p1548_p8 = por %p52_p5, %p51_p3  ;;  %p83_p10 = scmp.eq.s32.totalorder %s1169_s13, 1 }
   0xe   : > { %p1552_p9 = por %p77_p6, %p45_p1  ;;  %p1171_p12 = scmp.ge.s32.totalorder %s1487_s11, 2 }
   0xf   : > { %s1557_s20 = scalar_select %p36_p7, %s1475_s8, %s38_s15  }
  0x10   : > { %p1559_p11 = por %p83_p10, %p51_p3  ;;  %p1323_p13 = scmp.lt.s32.totalorder %s1487_s11, 2 }
  0x11   : > { %s103_s22 = sand.u32 1, %s1475_s8   ;;  %s1173_s24 = sshll.u32 %s1483_s10, 3 }
  0x12   : > { %s1172_s23 = sshll.u32 %s103_s22, 3  ;;  %s113_s27 = scalar_lea.hbm %s2935_s0, %s1173_s24 }
  0x13   : > { %s107_s28 = scalar_lea.vmem [#allocation2], %s1172_s23  ;;  %s115_s30 = sshll.u32 %s113_s27, 4  ;;  %s116_s30 = int_to_ptr.hbm [resolvable:$true] %s115_s30 }
  0x14   : > { %s117_s29 = sshll.u32 %s107_s28, 4  ;;  %p1316_p0 = pnand %p1323_p13, %p1542_p4  ;;  %s118_s29 = int_to_ptr.vmem [resolvable:$true] %s117_s29 }
  0x15   : > { %p1174_p1 = scmp.ge.s32.totalorder %s1487_s11, 1  ;;  %p122_p2 = scmp.lt.s32.totalorder %s1487_s11, 3 }
  0x16   : > { %s104_s2 = scalar_lea.sflag [#allocation3], %s103_s22 }
  0x17   : > { %1318 = dma.hbm_to_vmem [thread:$0]  (!%p1316_p0), %s116_s30, 128, %s118_s29, %s104_s2  }
  0x18   : > { %p123_p3 = pnand %p1174_p1, %p122_p2 }
  0x1a   : > { %126 = sbr.rel (%p123_p3) target bundleno = 308 (0x134), region = 24 }
  0x1f   : > { %s1575_s3 = sand.u32 1, %s1471_s7   ;;  %v154_v0 = vlaneseq }
  0x20   : > { %s1175_s4 = sshll.u32 %s1575_s3, 3  ;;  %s129_s5 = scalar_lea.sflag [#allocation3], %s1575_s3 }
  0x21   : > { %s1579_s12 = scalar_lea.vmem [#allocation2], %s1175_s4 }
  0x22   : > { %1458 = dma.done.wait (%p1548_p8), %s129_s5, 128  }
  0x23   : > { %1460 = vsyncadd (%p1548_p8), %s129_s5, 4294967168  ;;  %v1585_v1 = vshrl.u32 %v154_v0, 7  ;;  %v1587_v2 = vand.u32 127, %v154_v0  ;;  %v2975_v33 = vmov 1.0   ;;  %v2972_v34 = vmov 0.0   ;;  %s1176_s13 = sshll.u32 %s1575_s3, 4 }
  0x24   : > { %s151_s15 = scalar_lea.vmem [#allocation5], %s1176_s13  ;;  %s1310_s16 = sshll.u32 %s1479_s9, 4 }
  0x25   : > { %v1590_v3 = vadd.s32 120, %v1585_v1  ;;  %v1593_v4 = vadd.s32 112, %v1585_v1  ;;  %v1596_v5 = vadd.s32 104, %v1585_v1  ;;  %v1599_v6 = vadd.s32 96, %v1585_v1  ;;  %s1080_s22 = scalar_lea.hbm %s2936_s1, %s1310_s16  ;;  %s1082_s23 = sshll.u32 %s151_s15, 4  ;;  %s1083_s23 = int_to_ptr.vmem [resolvable:$true] %s1082_s23 }
  0x26   : > { %v1602_v7 = vadd.s32 88, %v1585_v1  ;;  %v1605_v8 = vadd.s32 80, %v1585_v1  ;;  %v1608_v9 = vadd.s32 72, %v1585_v1  ;;  %v1611_v10 = vadd.s32 64, %v1585_v1  ;;  %s1084_s24 = sshll.u32 %s1080_s22, 4  ;;  %s1067_s25 = scalar_lea.sflag [#allocation4], %s1575_s3  ;;  %s1085_s24 = int_to_ptr.hbm [resolvable:$true] %s1084_s24 }
  0x27   : > { %v2970_v11 = vmul.u32 2, %v1590_v3  ;;  %v1615_v12 = vadd.s32 1, %v1590_v3  ;;  %v2967_v13 = vmul.u32 2, %v1593_v4  ;;  %v1619_v14 = vadd.s32 1, %v1593_v4  ;;  %s1419_s26 = sshra.s32 %s1085_s24, 4  ;;  %s1425_s29 = scalar_lea.hbm %s2936_s1, 32  ;;  %s1420_s26 = int_to_ptr.hbm [resolvable:$true] %s1419_s26 }
  0x28   : > { %v2964_v15 = vmul.u32 2, %v1596_v5  ;;  %v1623_v16 = vadd.s32 1, %v1596_v5  ;;  %v2958_v17 = vmul.u32 2, %v1599_v6  ;;  %v1627_v18 = vadd.s32 1, %v1599_v6  ;;  %s1421_s9 = scalar_lea.hbm %s1420_s26, 16  ;;  %p1426_p7 = scmp.lt.s32.totalorder %s1420_s26, %s2936_s1 }
  0x29   : > { %vm220_vm0 = vcmp.ge.s32.totalorder %v1587_v2, %v2970_v11  ;;  %v2968_v19 = vmul.u32 2, %v1615_v12  ;;  %vm1636_vm1 = vcmp.ge.s32.totalorder %v1587_v2, %v2967_v13  ;;  %v2965_v21 = vmul.u32 2, %v1619_v14  ;;  %p1422_p4 = scmp.ne.s32.totalorder %s1420_s26, %s1421_s9  ;;  %p1427_p8 = scmp.lt.s32.totalorder %s1425_s29, %s1421_s9 }
  0x2a   : > { %vm1644_vm2 = vcmp.ge.s32.totalorder %v1587_v2, %v2964_v15  ;;  %v2959_v23 = vmul.u32 2, %v1623_v16  ;;  %vm1652_vm3 = vcmp.ge.s32.totalorder %v1587_v2, %v2958_v17  ;;  %v2957_v25 = vmul.u32 2, %v1627_v18 }
  0x2b   : > { %vm284_vm4 = vcmp.lt.s32.totalorder %v1587_v2, %v2968_v19  ;;  %vm282_vm5 = vcmp.lt.s32.totalorder %v1587_v2, %v2965_v21  ;;  %v2955_v26 = vmul.u32 2, %v1602_v7  ;;  %v1665_v27 = vadd.s32 1, %v1602_v7  ;;  %p1423_p5 = pnand %p1422_p4, %p1552_p9  ;;  %p1428_p10 = por %p1427_p8, %p1426_p7 }
  0x2c   : > { %vm1667_vm6 = vmand %vm220_vm0, %vm284_vm4  ;;  %vm1674_vm7 = vcmp.lt.s32.totalorder %v1587_v2, %v2959_v23  ;;  %vm1681_vm8 = vcmp.lt.s32.totalorder %v1587_v2, %v2957_v25  ;;  %v2947_v31 = vmul.u32 2, %v1605_v8  ;;  %v1687_v32 = vadd.s32 1, %v1605_v8 }
  0x2d   : > { %1209 = vmatpush.msk.msra.mxu0 %vm1667_vm6, %v2975_v33  ;;  %v1207_v35 = vsel %vm1667_vm6, 1.0, %v2972_v34  ;;  %vm1697_vm9 = vmand %vm1636_vm1, %vm282_vm5  ;;  %1225 = vmatpush.msk.msra.mxu3 %vm1667_vm6, %v2975_v33  ;;  %vm1707_vm10 = vcmp.ge.s32.totalorder %v1587_v2, %v2955_v26  ;;  %v2953_v38 = vmul.u32 2, %v1665_v27  ;;  %v2943_v39 = vmul.u32 2, %v1608_v9  ;;  %p1424_p6 = pneg %p1423_p5 }
  0x2e   : > { %v1713_v40 = vsub.f32 %v1207_v35, %v1207_v35  ;;  %v1205_v41 = vsel %vm1697_vm9, 1.0, %v2972_v34  ;;  %vm1722_vm11 = vmand %vm1644_vm2, %vm1674_vm7  ;;  %vm1729_vm12 = vcmp.ge.s32.totalorder %v1587_v2, %v2947_v31  ;;  %v2944_v44 = vmul.u32 2, %v1687_v32 }
  0x2f   : > { %1210 = vmatpush.msk.msra.mxu0 %vm1697_vm9, %v2975_v33  ;;  %v1737_v45 = vsub.f32 %v1205_v41, %v1205_v41  ;;  %v1203_v46 = vsel %vm1722_vm11, 1.0, %v2972_v34  ;;  %1226 = vmatpush.msk.msra.mxu3 %vm1697_vm9, %v2975_v33  ;;  %vm1749_vm13 = vmand %vm1652_vm3, %vm1681_vm8  ;;  %vm276_vm14 = vcmp.lt.s32.totalorder %v1587_v2, %v2953_v38  ;;  %vm1759_vm15 = vcmp.ge.s32.totalorder %v1587_v2, %v2943_v39  ;;  %p1429_p13 = pnand %p1428_p10, %p1424_p6 }
  0x30   : > { %526 = vmatpush.msra.mxu2 %v1713_v40  ;;  %v2956_v49 = vand.u32 4294901760, %v1713_v40  ;;  %v1765_v50 = vsub.f32 %v1203_v46, %v1203_v46  ;;  %v1201_v51 = vsel %vm1749_vm13, 1.0, %v2972_v34  ;;  %vm1772_vm0 = vmand %vm1707_vm10, %vm276_vm14  ;;  %vm274_vm1 = vcmp.lt.s32.totalorder %v1587_v2, %v2944_v44 }
  0x31   : > { %1211 = vmatpush.msk.msra.mxu0 %vm1722_vm11, %v2975_v33  ;;  %v2948_v53 = vand.u32 4294901760, %v1737_v45  ;;  %v1783_v54 = vsub.f32 %v1201_v51, %v1201_v51  ;;  %1227 = vmatpush.msk.msra.mxu3 %vm1722_vm11, %v2975_v33  ;;  %v1199_v55 = vsel %vm1772_vm0, 1.0, %v2972_v34  ;;  %vm1793_vm2 = vmand %vm1729_vm12, %vm274_vm1  ;;  %v1798_v57 = vadd.s32 1, %v1608_v9 }
  0x32   : > { %529 = vmatpush.msra.mxu2 %v1737_v45  ;;  %v426_v58 = vsub.f32 %v1713_v40, %v2956_v49  ;;  %v2945_v59 = vand.u32 4294901760, %v1765_v50  ;;  %v1805_v60 = vsub.f32 %v1199_v55, %v1199_v55  ;;  %v1197_v61 = vsel %vm1793_vm2, 1.0, %v2972_v34 }
  0x33   : > { %1212 = vmatpush.msk.msra.mxu0 %vm1749_vm13, %v2975_v33  ;;  %v432_v62 = vsub.f32 %v1737_v45, %v2948_v53  ;;  %1228 = vmatpush.msk.msra.mxu3 %vm1749_vm13, %v2975_v33  ;;  %v2942_v63 = vand.u32 4294901760, %v1783_v54  ;;  %v1820_v0 = vsub.f32 %v1197_v61, %v1197_v61  ;;  %v2941_v20 = vmul.u32 2, %v1798_v57 }
  0x34   : > { %v427_v22 = vand.u32 4294901760, %v426_v58  ;;  %532 = vmatpush.msra.mxu2 %v1765_v50  ;;  %v438_v24 = vsub.f32 %v1765_v50, %v2945_v59  ;;  %v2937_v29 = vand.u32 4294901760, %v1805_v60  ;;  %v2938_v30 = vmul.u32 2, %v1611_v10 }
  0x35   : > { %v433_v35 = vand.u32 4294901760, %v432_v62  ;;  %1213 = vmatpush.msk.msra.mxu0 %vm1772_vm0, %v2975_v33  ;;  %v444_v37 = vsub.f32 %v1783_v54, %v2942_v63  ;;  %1229 = vmatpush.msk.msra.mxu3 %vm1772_vm0, %v2975_v33  ;;  %vm272_vm3 = vcmp.lt.s32.totalorder %v1587_v2, %v2941_v20  ;;  %v1842_v41 = vadd.s32 1, %v1611_v10 }
  0x36   : > { %428 = vmatpush.msra.mxu1 %v427_v22  ;;  %535 = vmatpush.msra.mxu2 %v1783_v54  ;;  %v439_v43 = vand.u32 4294901760, %v438_v24  ;;  %vm1847_vm4 = vmand %vm1759_vm15, %vm272_vm3  ;;  %v3048_v46 = vmov 0  ;;  %v450_v51 = vsub.f32 %v1805_v60, %v2937_v29  ;;  %vm1857_vm5 = vcmp.ge.s32.totalorder %v1587_v2, %v2938_v30 }
  0x37   : > { %v3049_v46 = vsel %vm1847_vm4, 4294967295, %v3048_v46  ;;  %v2939_v58 = vand.u32 4294901760, %v1820_v0  ;;  %1214 = vmatpush.msk.msra.mxu0 %vm1793_vm2, %v2975_v33  ;;  %v445_v48 = vand.u32 4294901760, %v444_v37  ;;  %v1195_v61 = vsel %vm1847_vm4, 1.0, %v2972_v34  ;;  %1230 = vmatpush.msk.msra.mxu3 %vm1793_vm2, %v2975_v33 }
  0x38   : > { %3050 = vst [vmem:[#allocation8_spill] sm:$0xff] %v3049_v46  ;;  %v2940_v62 = vmul.u32 2, %v1842_v41  ;;  %v1873_v22 = vadd.s32 56, %v1585_v1  ;;  %434 = vmatpush.msra.mxu1 %v433_v35  ;;  %538 = vmatpush.msra.mxu2 %v1805_v60  ;;  %v451_v24 = vand.u32 4294901760, %v450_v51  ;;  %v1876_v29 = vsub.f32 %v1195_v61, %v1195_v61 }
  0x39   : > { %v456_v37 = vsub.f32 %v1820_v0, %v2939_v58  ;;  %v1882_v30 = vadd.s32 48, %v1585_v1  ;;  %1215 = vmatpush.msk.msra.mxu0 %vm1847_vm4, %v2975_v33  ;;  %1231 = vmatpush.msk.msra.mxu3 %vm1847_vm4, %v2975_v33  ;;  %v1898_v61 = vadd.s32 40, %v1585_v1  ;;  %v3053_v58 = vmov 0 }
  0x3a   : > { %vm270_vm7 = vcmp.lt.s32.totalorder %v1587_v2, %v2940_v62  ;;  %v2946_v35 = vmul.u32 2, %v1873_v22  ;;  %v1895_v51 = vadd.s32 1, %v1873_v22  ;;  %440 = vmatpush.msra.mxu1 %v439_v43  ;;  %541 = vmatpush.msra.mxu2 %v1820_v0  ;;  %v2949_v20 = vand.u32 4294901760, %v1876_v29 }
  0x3b   : > { %vm1903_vm8 = vmand %vm1857_vm5, %vm270_vm7  ;;  %v457_v62 = vand.u32 4294901760, %v456_v37  ;;  %v2950_v63 = vmul.u32 2, %v1882_v30  ;;  %v1910_v39 = vadd.s32 1, %v1882_v30  ;;  %v2952_v44 = vmul.u32 2, %v1898_v61 }
  0x3c   : > { %v3054_v58 = vsel %vm1903_vm8, 4294967295, %v3053_v58  ;;  %1216 = vmatpush.msk.msra.mxu0 %vm1903_vm8, %v2975_v33  ;;  %v1193_v43 = vsel %vm1903_vm8, 1.0, %v2972_v34  ;;  %vm1921_vm10 = vcmp.ge.s32.totalorder %v1587_v2, %v2946_v35  ;;  %v2951_v37 = vmul.u32 2, %v1895_v51  ;;  %1232 = vmatpush.msk.msra.mxu3 %vm1903_vm8, %v2975_v33 }
  0x3d   : > { %3055 = vst [vmem:[#allocation9_spill] sm:$0xff] %v3054_v58  ;;  %446 = vmatpush.msra.mxu1 %v445_v48  ;;  %544 = vmatpush.msra.mxu2 %v1876_v29  ;;  %v1931_v59 = vsub.f32 %v1193_v43, %v1193_v43  ;;  %v462_v35 = vsub.f32 %v1876_v29, %v2949_v20  ;;  %v2954_v53 = vmul.u32 2, %v1910_v39  ;;  %v1955_v43 = vadd.s32 1, %v1898_v61 }
  0x3e   : > { %vm1939_vm12 = vcmp.ge.s32.totalorder %v1587_v2, %v2950_v63  ;;  %vm268_vm14 = vcmp.lt.s32.totalorder %v1587_v2, %v2951_v37  ;;  %vm1950_vm15 = vcmp.ge.s32.totalorder %v1587_v2, %v2952_v44  ;;  %v1958_v20 = vadd.s32 32, %v1585_v1 }
  0x3f   : > { %452 = vmatpush.msra.mxu1 %v451_v24  ;;  %547 = vmatpush.msra.mxu2 %v1931_v59  ;;  %vm1963_vm1 = vmand %vm1921_vm10, %vm268_vm14  ;;  %v3062_v63 = vmov 0  ;;  %v463_v37 = vand.u32 4294901760, %v462_v35  ;;  %vm266_vm3 = vcmp.lt.s32.totalorder %v1587_v2, %v2954_v53  ;;  %v2960_v44 = vand.u32 4294901760, %v1931_v59 }
  0x40   : > { %v3063_v63 = vsel %vm1963_vm1, 4294967295, %v3062_v63  ;;  %v1972_v38 = vadd.s32 24, %v1585_v1  ;;  %1217 = vmatpush.msk.msra.mxu0 %vm1963_vm1, %v2975_v33  ;;  %v1191_v24 = vsel %vm1963_vm1, 1.0, %v2972_v34  ;;  %vm1982_vm5 = vmand %vm1939_vm12, %vm266_vm3  ;;  %v3065_v35 = vmov 0  ;;  %1233 = vmatpush.msk.msra.mxu3 %vm1963_vm1, %v2975_v33 }
  0x41   : > { %3064 = vst [vmem:[#allocation10_spill] sm:$0xff] %v3063_v63  ;;  %v3066_v35 = vsel %vm1982_vm5, 4294967295, %v3065_v35  ;;  %v2961_v55 = vmul.u32 2, %v1955_v43  ;;  %v2962_v53 = vmul.u32 2, %v1958_v20  ;;  %v1992_v26 = vadd.s32 1, %v1958_v20  ;;  %458 = vmatpush.msra.mxu1 %v457_v62 }
  0x42   : > { %3067 = vst [vmem:[#allocation11_spill] sm:$0xff] %v3066_v35  ;;  %v1994_v49 = vsub.f32 %v1191_v24, %v1191_v24  ;;  %v468_v31 = vsub.f32 %v1931_v59, %v2960_v44  ;;  %v1189_v25 = vsel %vm1982_vm5, 1.0, %v2972_v34  ;;  %v2963_v17 = vmul.u32 2, %v1972_v38  ;;  %1218 = vmatpush.msk.msra.mxu0 %vm1982_vm5, %v2975_v33  ;;  %1234 = vmatpush.msk.msra.mxu3 %vm1982_vm5, %v2975_v33 }
  0x43   : > { %v2006_v23 = vsub.f32 %v1189_v25, %v1189_v25  ;;  %vm264_vm7 = vcmp.lt.s32.totalorder %v1587_v2, %v2961_v55  ;;  %vm2017_vm10 = vcmp.ge.s32.totalorder %v1587_v2, %v2962_v53  ;;  %v2966_v24 = vmul.u32 2, %v1992_v26  ;;  %464 = vmatpush.msra.mxu1 %v463_v37 }
  0x44   : > { %550 = vmatpush.msra.mxu2 %v1994_v49  ;;  %v469_v25 = vand.u32 4294901760, %v468_v31  ;;  %vm2025_vm12 = vmand %vm1950_vm15, %vm264_vm7  ;;  %v3070_v44 = vmov 0  ;;  %v2969_v55 = vand.u32 4294901760, %v1994_v49  ;;  %vm2033_vm14 = vcmp.ge.s32.totalorder %v1587_v2, %v2963_v17 }
  0x45   : > { %v3071_v44 = vsel %vm2025_vm12, 4294967295, %v3070_v44  ;;  %v2038_v37 = vadd.s32 1, %v1972_v38  ;;  %1219 = vmatpush.msk.msra.mxu0 %vm2025_vm12, %v2975_v33  ;;  %v1187_v48 = vsel %vm2025_vm12, 1.0, %v2972_v34  ;;  %vm262_vm15 = vcmp.lt.s32.totalorder %v1587_v2, %v2966_v24  ;;  %1235 = vmatpush.msk.msra.mxu3 %vm2025_vm12, %v2975_v33 }
  0x46   : > { %3072 = vst [vmem:[#allocation12_spill] sm:$0xff] %v3071_v44  ;;  %v2971_v31 = vand.u32 4294901760, %v2006_v23  ;;  %v2054_v17 = vadd.s32 16, %v1585_v1  ;;  %470 = vmatpush.msra.mxu1 %v469_v25  ;;  %553 = vmatpush.msra.mxu2 %v2006_v23  ;;  %v474_v15 = vsub.f32 %v1994_v49, %v2969_v55  ;;  %v2060_v21 = vsub.f32 %v1187_v48, %v1187_v48  ;;  %vm2064_vm3 = vmand %vm2017_vm10, %vm262_vm15 }
  0x47   : > { %v3076_v24 = vmov 0  ;;  %v2070_v19 = vadd.s32 8, %v1585_v1  ;;  %1220 = vmatpush.msk.msra.mxu0 %vm2064_vm3, %v2975_v33  ;;  %v1185_v62 = vsel %vm2064_vm3, 1.0, %v2972_v34  ;;  %1236 = vmatpush.msk.msra.mxu3 %vm2064_vm3, %v2975_v33  ;;  %v3081_v33 = vmov 0 }
  0x48   : > { %3075 = vst [vmem:[#allocation13_spill] sm:$0xff] %v2060_v21  ;;  %v3077_v24 = vsel %vm2064_vm3, 4294967295, %v3076_v24  ;;  %v480_v25 = vsub.f32 %v2006_v23, %v2971_v31  ;;  %v2978_v48 = vmul.u32 2, %v2054_v17  ;;  %v2086_v55 = vadd.s32 1, %v2054_v17  ;;  %556 = vmatpush.msra.mxu2 %v2060_v21 }
  0x49   : > { %3078 = vst [vmem:[#allocation14_spill] sm:$0xff] %v3077_v24  ;;  %v475_v11 = vand.u32 4294901760, %v474_v15  ;;  %v2089_v13 = vsub.f32 %v1185_v62, %v1185_v62  ;;  %v3080_v31 = vmul.u32 2, %v2038_v37  ;;  %v2981_v34 = vand.u32 4294901760, %v2060_v21 }
  0x4a   : > { %v481_v44 = vand.u32 4294901760, %v480_v25  ;;  %vm2104_vm15 = vcmp.ge.s32.totalorder %v1587_v2, %v2978_v48  ;;  %v2984_v62 = vmul.u32 2, %v2086_v55  ;;  %v3086_v25 = vmov 0.0  }
  0x4b   : > { %3079 = vst [vmem:[#allocation15_spill] sm:$0xff] %v2089_v13  ;;  %vm260_vm7 = vcmp.lt.s32.totalorder %v1587_v2, %v3080_v31  ;;  %v2987_v31 = vmul.u32 2, %v2070_v19  ;;  %476 = vmatpush.msra.mxu1 %v475_v11  ;;  %559 = vmatpush.msra.mxu2 %v2089_v13  ;;  %v486_v53 = vsub.f32 %v2060_v21, %v2981_v34  ;;  %v2119_v35 = vadd.s32 1, %v2070_v19 }
  0x4c   : > { %vm2097_vm10 = vmand %vm2033_vm14, %vm260_vm7  ;;  %v3087_v63 = vmov 1.0   ;;  %vm258_vm14 = vcmp.lt.s32.totalorder %v1587_v2, %v2984_v62  ;;  %v2990_v48 = vmul.u32 2, %v1585_v1  ;;  %v3090_v58 = vmov 0 }
  0x4d   : > { %v3082_v33 = vsel %vm2097_vm10, 4294967295, %v3081_v33  ;;  %v1183_v24 = vsel %vm2097_vm10, 1.0, %v3086_v25  ;;  %1221 = vmatpush.msk.msra.mxu0 %vm2097_vm10, %v3087_v63  ;;  %1237 = vmatpush.msk.msra.mxu3 %vm2097_vm10, %v3087_v63  ;;  %vm2135_vm7 = vcmp.ge.s32.totalorder %v1587_v2, %v2987_v31  ;;  %vm2142_vm3 = vmand %vm2104_vm15, %vm258_vm14  ;;  %v3092_v62 = vand.u32 4294901760, %v2089_v13 }
  0x4e   : > { %3083 = vst [vmem:[#allocation16_spill] sm:$0xff] %v3082_v33  ;;  %v2124_v11 = vsub.f32 %v1183_v24, %v1183_v24  ;;  %482 = vmatpush.msra.mxu1 %v481_v44  ;;  %v487_v24 = vand.u32 4294901760, %v486_v53  ;;  %v3091_v58 = vsel %vm2142_vm3, 4294967295, %v3090_v58  ;;  %v2151_v31 = vadd.s32 1, %v1585_v1 }
  0x4f   : > { %v492_v33 = vsub.f32 %v2089_v13, %v3092_v62  ;;  %1222 = vmatpush.msk.msra.mxu0 %vm2142_vm3, %v3087_v63  ;;  %v1181_v44 = vsel %vm2142_vm3, 1.0, %v3086_v25  ;;  %vm2164_vm15 = vcmp.ge.s32.totalorder %v1587_v2, %v2990_v48  ;;  %v2169_v53 = vadd.s32 128, %v1587_v2  ;;  %1238 = vmatpush.msk.msra.mxu3 %vm2142_vm3, %v3087_v63 }
  0x50   : > { %562 = vmatpush.msra.mxu2 %v2124_v11  ;;  %488 = vmatpush.msra.mxu1 %v487_v24  ;;  %v2171_v13 = vsub.f32 %v1181_v44, %v1181_v44  ;;  %v3095_v46 = vmul.u32 2, %v2119_v35  ;;  %v3099_v44 = vmul.u32 2, %v1590_v3  ;;  %v3101_v48 = vmul.u32 2, %v1593_v4 }
  0x51   : > { %v493_v21 = vand.u32 4294901760, %v492_v33  ;;  %v3098_v33 = vand.u32 4294901760, %v2124_v11  ;;  %v3105_v4 = vmov 0  ;;  %v3145_v28 = vand.u32 4294901760, %v1805_v60 }
  0x52   : > { %vm256_vm14 = vcmp.lt.s32.totalorder %v1587_v2, %v3095_v46  ;;  %vm221_vm12 = vcmp.ge.s32.totalorder %v2169_v53, %v3099_v44  ;;  %v3100_v46 = vmul.u32 2, %v1615_v12  ;;  %vm2198_vm5 = vcmp.ge.s32.totalorder %v2169_v53, %v3101_v48  ;;  %565 = vmatpush.msra.mxu2 %v2171_v13 }
  0x53   : > { %vm2182_vm10 = vmand %vm2135_vm7, %vm256_vm14  ;;  %v498_v24 = vsub.f32 %v2124_v11, %v3098_v33  ;;  %494 = vmatpush.msra.mxu1 %v493_v21  ;;  %v3104_v33 = vmul.u32 2, %v2151_v31  ;;  %v2997_v12 = vand.u32 4294901760, %v2171_v13  ;;  %v3108_v48 = vmul.u32 2, %v1619_v14 }
  0x54   : > { %vm285_vm3 = vcmp.lt.s32.totalorder %v2169_v53, %v3100_v46  ;;  %v1179_v3 = vsel %vm2182_vm10, 1.0, %v3086_v25  ;;  %1223 = vmatpush.msk.msra.mxu0 %vm2182_vm10, %v3087_v63  ;;  %1239 = vmatpush.msk.msra.mxu3 %vm2182_vm10, %v3087_v63  ;;  %v3112_v46 = vmul.u32 2, %v1596_v5  ;;  %v3116_v5 = vmul.u32 2, %v1623_v16 }
  0x55   : > { %vm254_vm7 = vcmp.lt.s32.totalorder %v1587_v2, %v3104_v33  ;;  %vm2210_vm14 = vmand %vm221_vm12, %vm285_vm3  ;;  %vm283_vm1 = vcmp.lt.s32.totalorder %v2169_v53, %v3108_v48  ;;  %v499_v21 = vand.u32 4294901760, %v498_v24  ;;  %v2220_v44 = vsub.f32 %v1179_v3, %v1179_v3 }
  0x56   : > { %v3106_v4 = vsel %vm2210_vm14, 4294967295, %v3105_v4  ;;  %vm2224_vm8 = vmand %vm2164_vm15, %vm254_vm7  ;;  %v3109_v2 = vmov 0  ;;  %v1208_v14 = vsel %vm2210_vm14, 1.0, %v3086_v25  ;;  %vm217_vm12 = vcmp.ge.s32.totalorder %v2169_v53, %v3112_v46 }
  0x57   : > { %3107 = vst [vmem:[#allocation17_spill] sm:$0xff] %v3106_v4  ;;  %v3110_v2 = vsel %vm2224_vm8, 4294967295, %v3109_v2  ;;  %v504_v62 = vsub.f32 %v2171_v13, %v2997_v12  ;;  %v1177_v24 = vsel %vm2224_vm8, 1.0, %v3086_v25  ;;  %vm2245_vm3 = vmand %vm2198_vm5, %vm283_vm1  ;;  %v3113_v3 = vmov 0  ;;  %500 = vmatpush.msra.mxu1 %v499_v21  ;;  %568 = vmatpush.msra.mxu2 %v2220_v44 }
  0x58   : > { %3111 = vst [vmem:[#allocation18_spill] sm:$0xff] %v3110_v2  ;;  %v3114_v3 = vsel %vm2245_vm3, 4294967295, %v3113_v3  ;;  %v2249_v33 = vsub.f32 %v1208_v14, %v1208_v14  ;;  %vm281_vm15 = vcmp.lt.s32.totalorder %v2169_v53, %v3116_v5  ;;  %v2255_v48 = vsub.f32 %v1177_v24, %v1177_v24  ;;  %1224 = vmatpush.msk.msra.mxu0 %vm2224_vm8, %v3087_v63 }
  0x59   : > { %3115 = vst [vmem:[#allocation19_spill] sm:$0xff] %v3114_v3  ;;  %v2999_v46 = vand.u32 4294901760, %v2220_v44  ;;  %vm2258_vm7 = vmand %vm217_vm12, %vm281_vm15  ;;  %v3117_v12 = vmov 0  ;;  %v1206_v34 = vsel %vm2245_vm3, 1.0, %v3086_v25  ;;  %v3119_v14 = vmul.u32 2, %v1599_v6  ;;  %1240 = vmatpush.msk.msra.mxu3 %vm2224_vm8, %v3087_v63 }
  0x5a   : > { %v3118_v12 = vsel %vm2258_vm7, 4294967295, %v3117_v12  ;;  %v505_v16 = vand.u32 4294901760, %v504_v62  ;;  %v3003_v21 = vand.u32 4294901760, %v2249_v33  ;;  %v2275_v24 = vsub.f32 %v1206_v34, %v1206_v34  ;;  %571 = vmatpush.msra.mxu2 %v2255_v48 }
  0x5b   : > { %vm215_vm1 = vcmp.ge.s32.totalorder %v2169_v53, %v3119_v14  ;;  %v3120_v5 = vmul.u32 2, %v1627_v18  ;;  %v3121_v6 = vand.u32 4294901760, %v1713_v40  ;;  %v510_v62 = vsub.f32 %v2220_v44, %v2999_v46 }
  0x5c   : > { %v3004_v14 = vand.u32 4294901760, %v2255_v48  ;;  %v3122_v2 = vmov 0  ;;  %v1204_v18 = vsel %vm2258_vm7, 1.0, %v3086_v25  ;;  %v3124_v34 = vmul.u32 2, %v1602_v7  ;;  %506 = vmatpush.msra.mxu1 %v505_v16  ;;  %1257 = vmatpush.msk.msrb.mxu2 %vm2210_vm14, %v3087_v63 }
  0x5d   : > { %vm279_vm5 = vcmp.lt.s32.totalorder %v2169_v53, %v3120_v5  ;;  %620 = vmatpush.msrb.mxu0 %v3121_v6  ;;  %v767_v40 = vsub.f32 %v2249_v33, %v3003_v21  ;;  %v3007_v5 = vand.u32 4294901760, %v2275_v24  ;;  %v2304_v6 = vsub.f32 %v1204_v18, %v1204_v18 }
  0x5e   : > { %vm2287_vm12 = vmand %vm215_vm1, %vm279_vm5  ;;  %vm213_vm15 = vcmp.ge.s32.totalorder %v2169_v53, %v3124_v34  ;;  %v3125_v46 = vmul.u32 2, %v1665_v27  ;;  %v511_v7 = vand.u32 4294901760, %v510_v62  ;;  %v3126_v34 = vand.u32 4294901760, %v1737_v45  ;;  %1258 = vmatpush.msk.msrb.mxu2 %vm2245_vm3, %v3087_v63 }
  0x5f   : > { %v3123_v2 = vsel %vm2287_vm12, 4294967295, %v3122_v2  ;;  %v516_v16 = vsub.f32 %v2255_v48, %v3004_v14  ;;  %v1202_v18 = vsel %vm2287_vm12, 1.0, %v3086_v25  ;;  %v3129_v27 = vmul.u32 2, %v1605_v8 }
  0x60   : > { %vm277_vm1 = vcmp.lt.s32.totalorder %v2169_v53, %v3125_v46  ;;  %624 = vmatpush.msrb.mxu0 %v3126_v34  ;;  %v768_v45 = vand.u32 4294901760, %v767_v40  ;;  %v773_v62 = vsub.f32 %v2275_v24, %v3007_v5  ;;  %v778_v34 = vand.u32 4294901760, %v2304_v6  ;;  %512 = vmatpush.msra.mxu1 %v511_v7  ;;  %v3227_v15 = vld [vmem:[#allocation19_spill] sm:$0xff] }
  0x61   : > { %vm2314_vm5 = vmand %vm213_vm15, %vm277_vm1  ;;  %vm2324_vm8 = vcmp.ge.s32.totalorder %v2169_v53, %v3129_v27  ;;  %v2335_v21 = vsub.f32 %v1202_v18, %v1202_v18  ;;  %v517_v8 = vand.u32 4294901760, %v516_v16  ;;  %v3132_v27 = vand.u32 4294901760, %v1765_v50  ;;  %1259 = vmatpush.msk.msrb.mxu2 %vm2258_vm7, %v3087_v63 }
  0x62   : > { %v3133_v14 = vmul.u32 2, %v1687_v32  ;;  %v1200_v40 = vsel %vm2314_vm5, 1.0, %v3086_v25  ;;  %v3134_v3 = vmul.u32 2, %v1608_v9  ;;  %769 = vmatpush.msrb.mxu3 %v768_v45  ;;  %v774_v50 = vand.u32 4294901760, %v773_v62 }
  0x63   : > { %628 = vmatpush.msrb.mxu0 %v3132_v27  ;;  %v779_v32 = vsub.f32 %v2304_v6, %v778_v34  ;;  %518 = vmatpush.msra.mxu1 %v517_v8  ;;  %v3139_v7 = vand.u32 4294901760, %v1783_v54  ;;  %v3140_v16 = vmul.u32 2, %v1798_v57  ;;  %v3141_v46 = vmul.u32 2, %v1611_v10 }
  0x64   : > { %vm275_vm15 = vcmp.lt.s32.totalorder %v2169_v53, %v3133_v14  ;;  %vm2348_vm1 = vcmp.ge.s32.totalorder %v2169_v53, %v3134_v3  ;;  %v784_v14 = vand.u32 4294901760, %v2335_v21  ;;  %v2365_v3 = vsub.f32 %v1200_v40, %v1200_v40  ;;  %775 = vmatpush.msrb.mxu3 %v774_v50  ;;  %1260 = vmatpush.msk.msrb.mxu2 %vm2287_vm12, %v3087_v63 }
  0x65   : > { %vm2361_vm3 = vmand %vm2324_vm8, %vm275_vm15  ;;  %632 = vmatpush.msrb.mxu0 %v3139_v7  ;;  %vm273_vm7 = vcmp.lt.s32.totalorder %v2169_v53, %v3140_v16  ;;  %vm207_vm8 = vcmp.ge.s32.totalorder %v2169_v53, %v3141_v46  ;;  %v3142_v45 = vmul.u32 2, %v1842_v41  ;;  %1241 = vmatpush.msk.msrb.mxu1 %vm1667_vm6, %v3087_v63  ;;  %v780_v54 = vand.u32 4294901760, %v779_v32 }
  0x66   : > { %v1198_v18 = vsel %vm2361_vm3, 1.0, %v3086_v25  ;;  %v785_v57 = vsub.f32 %v2335_v21, %v784_v14  ;;  %v790_v62 = vand.u32 4294901760, %v2365_v3  ;;  %vm2390_vm14 = vmand %vm2348_vm1, %vm273_vm7  ;;  %v3148_v27 = vmul.u32 2, %v1873_v22  ;;  %1261 = vmatpush.msk.msrb.mxu2 %vm2314_vm5, %v3087_v63 }
  0x67   : > { %vm271_vm15 = vcmp.lt.s32.totalorder %v2169_v53, %v3142_v45  ;;  %v2394_v41 = vsub.f32 %v1198_v18, %v1198_v18  ;;  %636 = vmatpush.msrb.mxu0 %v3145_v28  ;;  %v1196_v5 = vsel %vm2390_vm14, 1.0, %v3086_v25  ;;  %v3149_v40 = vmul.u32 2, %v1895_v51  ;;  %1242 = vmatpush.msk.msrb.mxu1 %vm1697_vm9, %v3087_v63 }
  0x68   : > { %vm2401_vm6 = vmand %vm207_vm8, %vm271_vm15  ;;  %vm205_vm7 = vcmp.ge.s32.totalorder %v2169_v53, %v3148_v27  ;;  %v3150_v50 = vmul.u32 2, %v1882_v30  ;;  %781 = vmatpush.msrb.mxu3 %v780_v54  ;;  %v786_v32 = vand.u32 4294901760, %v785_v57  ;;  %v791_v22 = vsub.f32 %v2365_v3, %v790_v62  ;;  %1262 = vmatpush.msk.msrb.mxu2 %vm2361_vm3, %v3087_v63 }
  0x69   : > { %vm269_vm1 = vcmp.lt.s32.totalorder %v2169_v53, %v3149_v40  ;;  %v796_v51 = vand.u32 4294901760, %v2394_v41  ;;  %v2428_v7 = vsub.f32 %v1196_v5, %v1196_v5  ;;  %v3155_v36 = vand.u32 4294901760, %v1820_v0  ;;  %1243 = vmatpush.msk.msrb.mxu1 %vm1722_vm11, %v3087_v63 }
  0x6a   : > { %vm2417_vm12 = vcmp.ge.s32.totalorder %v2169_v53, %v3150_v50  ;;  %vm2430_vm8 = vmand %vm205_vm7, %vm269_vm1  ;;  %v1194_v16 = vsel %vm2401_vm6, 1.0, %v3086_v25  ;;  %v3156_v18 = vmul.u32 2, %v1910_v39  ;;  %v3157_v45 = vmul.u32 2, %v1898_v61  ;;  %787 = vmatpush.msrb.mxu3 %v786_v32  ;;  %1263 = vmatpush.msk.msrb.mxu2 %vm2390_vm14, %v3087_v63 }
  0x6b   : > { %640 = vmatpush.msrb.mxu0 %v3155_v36  ;;  %v1192_v46 = vsel %vm2430_vm8, 1.0, %v3086_v25  ;;  %v792_v0 = vand.u32 4294901760, %v791_v22  ;;  %v797_v39 = vsub.f32 %v2394_v41, %v796_v51  ;;  %v802_v57 = vand.u32 4294901760, %v2428_v7  ;;  %1244 = vmatpush.msk.msrb.mxu1 %vm1749_vm13, %v3087_v63 }
  0x6c   : > { %vm267_vm9 = vcmp.lt.s32.totalorder %v2169_v53, %v3156_v18  ;;  %vm2451_vm15 = vcmp.ge.s32.totalorder %v2169_v53, %v3157_v45  ;;  %v2462_v28 = vsub.f32 %v1194_v16, %v1194_v16  ;;  %v3162_v42 = vand.u32 4294901760, %v1876_v29  ;;  %1264 = vmatpush.msk.msrb.mxu2 %vm2401_vm6, %v3087_v63 }
  0x6d   : > { %vm2466_vm7 = vmand %vm2417_vm12, %vm267_vm9  ;;  %v2475_v5 = vsub.f32 %v1192_v46, %v1192_v46  ;;  %v3163_v27 = vmul.u32 2, %v1955_v43  ;;  %v3164_v50 = vmul.u32 2, %v1958_v20  ;;  %793 = vmatpush.msrb.mxu3 %v792_v0  ;;  %v798_v29 = vand.u32 4294901760, %v797_v39  ;;  %1245 = vmatpush.msk.msrb.mxu1 %vm1772_vm0, %v3087_v63 }
  0x6e   : > { %644 = vmatpush.msrb.mxu0 %v3162_v42  ;;  %v1190_v40 = vsel %vm2466_vm7, 1.0, %v3086_v25  ;;  %v803_v43 = vsub.f32 %v2428_v7, %v802_v57  ;;  %v808_v32 = vand.u32 4294901760, %v2462_v28  ;;  %v3169_v47 = vand.u32 4294901760, %v1931_v59  ;;  %1265 = vmatpush.msk.msrb.mxu2 %vm2430_vm8, %v3087_v63 }
  0x6f   : > { %vm265_vm11 = vcmp.lt.s32.totalorder %v2169_v53, %v3163_v27  ;;  %vm2486_vm12 = vcmp.ge.s32.totalorder %v2169_v53, %v3164_v50  ;;  %v2503_v22 = vsub.f32 %v1190_v40, %v1190_v40  ;;  %v814_v36 = vand.u32 4294901760, %v2475_v5  ;;  %799 = vmatpush.msrb.mxu3 %v798_v29  ;;  %1246 = vmatpush.msk.msrb.mxu1 %vm1793_vm2, %v3087_v63 }
  0x70   : > { %vm2499_vm1 = vmand %vm2451_vm15, %vm265_vm11  ;;  %648 = vmatpush.msrb.mxu0 %v3169_v47  ;;  %v3170_v16 = vmul.u32 2, %v1992_v26  ;;  %v3171_v46 = vmul.u32 2, %v1972_v38  ;;  %v804_v59 = vand.u32 4294901760, %v803_v43  ;;  %v809_v26 = vsub.f32 %v2462_v28, %v808_v32  ;;  %v153_v43 = vld [vmem:[%s1579_s12] sm:$0xff]  ;;  %1266 = vmatpush.msk.msrb.mxu2 %vm2466_vm7, %v3087_v63 }
  0x71   : > { %v1188_v18 = vsel %vm2499_vm1, 1.0, %v3086_v25  ;;  %v820_v54 = vand.u32 4294901760, %v2503_v22  ;;  %v3176_v52 = vand.u32 4294901760, %v1994_v49  ;;  %v815_v39 = vsub.f32 %v2475_v5, %v814_v36  ;;  %1247 = vmatpush.msk.msrb.mxu1 %vm1847_vm4, %v3087_v63 }
  0x72   : > { %vm263_vm13 = vcmp.lt.s32.totalorder %v2169_v53, %v3170_v16  ;;  %vm2520_vm9 = vcmp.ge.s32.totalorder %v2169_v53, %v3171_v46  ;;  %v2537_v0 = vsub.f32 %v1188_v18, %v1188_v18  ;;  %v3177_v42 = vmul.u32 2, %v2038_v37  ;;  %805 = vmatpush.msrb.mxu3 %v804_v59  ;;  %1267 = vmatpush.msk.msrb.mxu2 %vm2499_vm1, %v3087_v63 }
  0x73   : > { %vm2533_vm15 = vmand %vm2486_vm12, %vm263_vm13  ;;  %652 = vmatpush.msrb.mxu0 %v3176_v52  ;;  %v3178_v40 = vmul.u32 2, %v2054_v17  ;;  %v810_v49 = vand.u32 4294901760, %v809_v26  ;;  %v821_v37 = vsub.f32 %v2503_v22, %v820_v54  ;;  %v3183_v56 = vand.u32 4294901760, %v2006_v23 }
  0x74   : > { %vm261_vm0 = vcmp.lt.s32.totalorder %v2169_v53, %v3177_v42  ;;  %v1186_v27 = vsel %vm2533_vm15, 1.0, %v3086_v25  ;;  %v826_v60 = vand.u32 4294901760, %v2537_v0  ;;  %v816_v47 = vand.u32 4294901760, %v815_v39  ;;  %v3191_v39 = vld [vmem:[#allocation13_spill] sm:$0xff]  ;;  %1268 = vmatpush.msk.msrb.mxu2 %vm2533_vm15, %v3087_v63 }
  0x75   : > { %vm2556_vm11 = vcmp.ge.s32.totalorder %v2169_v53, %v3178_v40  ;;  %vm2569_vm12 = vmand %vm2520_vm9, %vm261_vm0  ;;  %v2573_v29 = vsub.f32 %v1186_v27, %v1186_v27  ;;  %656 = vmatpush.msrb.mxu0 %v3183_v56  ;;  %v3184_v16 = vmul.u32 2, %v2086_v55  ;;  %v3185_v46 = vmul.u32 2, %v2070_v19  ;;  %811 = vmatpush.msrb.mxu3 %v810_v49  ;;  %v3197_v56 = vld [vmem:[#allocation9_spill] sm:$0xff] }
  0x76   : > { %v1184_v18 = vsel %vm2569_vm12, 1.0, %v3086_v25  ;;  %v822_v23 = vand.u32 4294901760, %v821_v37  ;;  %v827_v55 = vsub.f32 %v2537_v0, %v826_v60  ;;  %v3192_v42 = vand.u32 4294901760, %v3191_v39  ;;  %1269 = vmatpush.msk.msrb.mxu2 %vm2569_vm12, %v3087_v63 }
  0x77   : > { %vm259_vm2 = vcmp.lt.s32.totalorder %v2169_v53, %v3184_v16  ;;  %vm2590_vm13 = vcmp.ge.s32.totalorder %v2169_v53, %v3185_v46  ;;  %v832_v26 = vand.u32 4294901760, %v2573_v29  ;;  %v2607_v52 = vsub.f32 %v1184_v18, %v1184_v18  ;;  %817 = vmatpush.msrb.mxu3 %v816_v47  ;;  %v3201_v47 = vld [vmem:[#allocation15_spill] sm:$0xff] }
  0x78   : > { %vm2603_vm9 = vmand %vm2556_vm11, %vm259_vm2  ;;  %660 = vmatpush.msrb.mxu0 %v3192_v42  ;;  %v3193_v27 = vmul.u32 2, %v2119_v35  ;;  %v2620_v50 = vand.u32 4294901760, %v153_v43  ;;  %v3194_v49 = vmul.u32 2, %v1585_v1  ;;  %vm3198_vm11 = vnez %v3197_v56  ;;  %v3204_v42 = vld [vmem:[#allocation10_spill] sm:$0xff]  ;;  %v3209_v56 = vld [vmem:[#allocation11_spill] sm:$0xff] }
  0x79   : > { %v1182_v40 = vsel %vm2603_vm9, 1.0, %v3086_v25  ;;  %1248 = vmatpush.msk.msrb.mxu1 %vm3198_vm11, %v3087_v63  ;;  %v828_v35 = vand.u32 4294901760, %v827_v55  ;;  %v833_v16 = vsub.f32 %v2573_v29, %v832_v26  ;;  %v838_v18 = vand.u32 4294901760, %v2607_v52  ;;  %823 = vmatpush.msrb.mxu3 %v822_v23 }
  0x7a   : > { %vm257_vm4 = vcmp.lt.s32.totalorder %v2169_v53, %v3193_v27  ;;  %vm2625_vm0 = vcmp.ge.s32.totalorder %v2169_v53, %v3194_v49  ;;  %v2642_v46 = vsub.f32 %v1182_v40, %v1182_v40  ;;  %v3202_v59 = vand.u32 4294901760, %v3201_v47  ;;  %1270 = vmatpush.msk.msrb.mxu2 %vm2603_vm9, %v3087_v63  ;;  %520 = vmatmul.f32.vlgmr.msra.gmra.mxu1 %v2620_v50 }
  0x7b   : > { %vm2638_vm2 = vmand %vm2590_vm13, %vm257_vm4  ;;  %v2650_v55 = vsub.f32 %v153_v43, %v2620_v50  ;;  %v3203_v39 = vmul.u32 2, %v2151_v31  ;;  %vm3205_vm13 = vnez %v3204_v42  ;;  %v834_v27 = vand.u32 4294901760, %v833_v16  ;;  %829 = vmatpush.msrb.mxu3 %v828_v35  ;;  %v3212_v35 = vld [vmem:[#allocation12_spill] sm:$0xff] }
  0x7c   : > { %664 = vmatpush.msrb.mxu0 %v3202_v59  ;;  %v1180_v45 = vsel %vm2638_vm2, 1.0, %v3086_v25  ;;  %1249 = vmatpush.msk.msrb.mxu1 %vm3205_vm13, %v3087_v63  ;;  %v839_v40 = vsub.f32 %v2607_v52, %v838_v18  ;;  %v844_v43 = vand.u32 4294901760, %v2642_v46  ;;  %v3208_v23 = vand.u32 4294901760, %v2124_v11 }
  0x7d   : > { %vm255_vm11 = vcmp.lt.s32.totalorder %v2169_v53, %v3203_v39  ;;  %v2671_v53 = vsub.f32 %v1180_v45, %v1180_v45  ;;  %v2679_v49 = vand.u32 4294901760, %v2650_v55  ;;  %835 = vmatpush.msrb.mxu3 %v834_v27  ;;  %1271 = vmatpush.msk.msrb.mxu2 %vm2638_vm2, %v3087_v63 }
  0x7e   : > { %vm2667_vm4 = vmand %vm2625_vm0, %vm255_vm11  ;;  %668 = vmatpush.msrb.mxu0 %v3208_v23  ;;  %vm3210_vm0 = vnez %v3209_v56  ;;  %v840_v16 = vand.u32 4294901760, %v839_v40  ;;  %v845_v47 = vsub.f32 %v2642_v46, %v844_v43  ;;  %vm3213_vm11 = vnez %v3212_v35  ;;  %574 = vmatmul.f32.vlgmr.msra.gmra.mxu2 %v2650_v55 }
  0x7f   : > { %v1178_v37 = vsel %vm2667_vm4, 1.0, %v3086_v25  ;;  %1250 = vmatpush.msk.msrb.mxu1 %vm3210_vm0, %v3087_v63  ;;  %v850_v11 = vand.u32 4294901760, %v2671_v53  ;;  %v3211_v25 = vand.u32 4294901760, %v2171_v13  ;;  %v417_v39 = vsub.f32 %v2650_v55, %v2679_v49  ;;  %1272 = vmatpush.msk.msrb.mxu2 %vm2667_vm4, %v3087_v63 }
  0x80   : > { %v2691_v59 = vsub.f32 %v1178_v37, %v1178_v37  ;;  %v846_v45 = vand.u32 4294901760, %v845_v47  ;;  %v3214_v13 = vand.u32 4294901760, %v2220_v44  ;;  %v3215_v37 = vld [vmem:[#allocation14_spill] sm:$0xff]  ;;  %841 = vmatpush.msrb.mxu3 %v840_v16  ;;  %v3217_v56 = vand.u32 4294901760, %v2255_v48  ;;  %v3218_v47 = vld [vmem:[#allocation16_spill] sm:$0xff] }
  0x81   : > { %672 = vmatpush.msrb.mxu0 %v3211_v25  ;;  %1251 = vmatpush.msk.msrb.mxu1 %vm3213_vm11, %v3087_v63  ;;  %v851_v42 = vsub.f32 %v2671_v53, %v850_v11  ;;  %v2712_v23 = vand.u32 4294901760, %v417_v39  ;;  %vm3216_vm13 = vnez %v3215_v37  ;;  %vm3219_vm0 = vnez %v3218_v47  ;;  %v3223_v25 = vld [vmem:[#allocation17_spill] sm:$0xff]  ;;  %v3225_v39 = vld [vmem:[#allocation18_spill] sm:$0xff] }
  0x82   : > { %v856_v40 = vand.u32 4294901760, %v2691_v59  ;;  %847 = vmatpush.msrb.mxu3 %v846_v45  ;;  %vm3220_vm11 = vnez %v3091_v58  ;;  %v3221_v48 = vand.u32 4294901760, %v2249_v33  ;;  %v3222_v58 = vand.u32 4294901760, %v2275_v24 }
  0x83   : > { %676 = vmatpush.msrb.mxu0 %v3214_v13  ;;  %1252 = vmatpush.msk.msrb.mxu1 %vm3216_vm13, %v3087_v63  ;;  %v852_v44 = vand.u32 4294901760, %v851_v42  ;;  %vm3224_vm13 = vnez %v3223_v25 }
  0x84   : > { %v857_v27 = vsub.f32 %v2691_v59, %v856_v40  ;;  %419 = vmatmul.f32.vlgmr.msra.gmra.mxu0 %v2712_v23  ;;  %613 = vmatmul.f32.vlgmr.msra.gmra.mxu3 %v2679_v49 }
  0x85   : > { %680 = vmatpush.msrb.mxu0 %v3217_v56  ;;  %1253 = vmatpush.msk.msrb.mxu1 %vm3219_vm0, %v3087_v63  ;;  %vm3226_vm0 = vnez %v3225_v39 }
  0x86   : > { %v858_v16 = vand.u32 4294901760, %v857_v27  ;;  %853 = vmatpush.msrb.mxu3 %v852_v44  ;;  %961 = vmatpush.msra.mxu2 %v3221_v48 }
  0x87   : > { %1254 = vmatpush.msk.msrb.mxu1 %vm3220_vm11, %v3087_v63  ;;  %867 = vmatpush.msra.mxu0 %v2249_v33  ;;  %vm3229_vm11 = vnez %v3118_v12 }
  0x88   : > { %859 = vmatpush.msrb.mxu3 %v858_v16  ;;  %965 = vmatpush.msra.mxu2 %v3222_v58 }
  0x89   : > { %1255 = vmatpush.msk.msrb.mxu1 %vm2182_vm10, %v3087_v63  ;;  %870 = vmatpush.msra.mxu0 %v2275_v24  ;;  %vm3228_vm10 = vnez %v3227_v15 }
  0x8a   : > { %1289 = vmatpush.msk.msra.mxu3 %vm3224_vm13, %v3087_v63  ;;  %969 = vmatpush.msra.mxu2 %v778_v34 }
  0x8b   : > { %1256 = vmatpush.msk.msrb.mxu1 %vm3226_vm0, %v3087_v63  ;;  %873 = vmatpush.msra.mxu0 %v2304_v6 }
  0x8c   : > { %1290 = vmatpush.msk.msra.mxu3 %vm3228_vm10, %v3087_v63  ;;  %973 = vmatpush.msra.mxu2 %v784_v14 }
  0x8d   : > { %1273 = vmatpush.msk.msra.mxu1 %vm3224_vm13, %v3087_v63  ;;  %876 = vmatpush.msra.mxu0 %v2335_v21  ;;  %vm3230_vm13 = vnez %v3123_v2 }
  0x8e   : > { %1291 = vmatpush.msk.msra.mxu3 %vm3229_vm11, %v3087_v63  ;;  %682 = vmatmul.f32.vlgmr.msrb.gmra.mxu0 %v2620_v50 }
  0x8f   : > { %1274 = vmatpush.msk.msra.mxu1 %vm3228_vm10, %v3087_v63  ;;  %879 = vmatpush.msra.mxu0 %v2365_v3 }
  0x90   : > { %977 = vmatpush.msra.mxu2 %v790_v62  ;;  %1292 = vmatpush.msk.msra.mxu3 %vm3230_vm13, %v3087_v63 }
  0x91   : > { %1275 = vmatpush.msk.msra.mxu1 %vm3229_vm11, %v3087_v63  ;;  %882 = vmatpush.msra.mxu0 %v2394_v41 }
  0x92   : > { %719 = vmatmul.f32.vlgmr.msrb.gmra.mxu1 %v2620_v50  ;;  %981 = vmatpush.msra.mxu2 %v796_v51 }
  0x93   : > { %1276 = vmatpush.msk.msra.mxu1 %vm3230_vm13, %v3087_v63  ;;  %1293 = vmatpush.msk.msra.mxu3 %vm2314_vm5, %v3087_v63 }
  0x94   : > { %885 = vmatpush.msra.mxu0 %v2428_v7  ;;  %985 = vmatpush.msra.mxu2 %v802_v57 }
  0x95   : > { %1277 = vmatpush.msk.msra.mxu1 %vm2314_vm5, %v3087_v63  ;;  %1294 = vmatpush.msk.msra.mxu3 %vm2361_vm3, %v3087_v63 }
  0x96   : > { %888 = vmatpush.msra.mxu0 %v2462_v28  ;;  %989 = vmatpush.msra.mxu2 %v808_v32 }
  0x97   : > { %1278 = vmatpush.msk.msra.mxu1 %vm2361_vm3, %v3087_v63  ;;  %1295 = vmatpush.msk.msra.mxu3 %vm2390_vm14, %v3087_v63 }
  0x98   : > { %891 = vmatpush.msra.mxu0 %v2475_v5  ;;  %993 = vmatpush.msra.mxu2 %v814_v36 }
  0x99   : > { %1279 = vmatpush.msk.msra.mxu1 %vm2390_vm14, %v3087_v63  ;;  %1296 = vmatpush.msk.msra.mxu3 %vm2401_vm6, %v3087_v63 }
  0x9a   : > { %894 = vmatpush.msra.mxu0 %v2503_v22  ;;  %997 = vmatpush.msra.mxu2 %v820_v54 }
  0x9b   : > { %1280 = vmatpush.msk.msra.mxu1 %vm2401_vm6, %v3087_v63  ;;  %1297 = vmatpush.msk.msra.mxu3 %vm2430_vm8, %v3087_v63 }
  0x9c   : > { %897 = vmatpush.msra.mxu0 %v2537_v0  ;;  %1001 = vmatpush.msra.mxu2 %v826_v60 }
  0x9d   : > { %1281 = vmatpush.msk.msra.mxu1 %vm2430_vm8, %v3087_v63  ;;  %1298 = vmatpush.msk.msra.mxu3 %vm2466_vm7, %v3087_v63 }
  0x9e   : > { %900 = vmatpush.msra.mxu0 %v2573_v29  ;;  %1005 = vmatpush.msra.mxu2 %v832_v26 }
  0x9f   : > { %1282 = vmatpush.msk.msra.mxu1 %vm2466_vm7, %v3087_v63  ;;  %1299 = vmatpush.msk.msra.mxu3 %vm2499_vm1, %v3087_v63 }
  0xa0   : > { %760 = vmatmul.f32.vlgmr.msrb.gmra.mxu2 %v2712_v23  ;;  %861 = vmatmul.f32.vlgmr.msrb.gmra.mxu3 %v2620_v50 }
  0xa1   : > { %903 = vmatpush.msra.mxu0 %v2607_v52  ;;  %1283 = vmatpush.msk.msra.mxu1 %vm2499_vm1, %v3087_v63 }
  0xa2   : > { %1009 = vmatpush.msra.mxu2 %v838_v18  ;;  %1300 = vmatpush.msk.msra.mxu3 %vm2533_vm15, %v3087_v63 }
  0xa3   : > { %906 = vmatpush.msra.mxu0 %v2642_v46  ;;  %1284 = vmatpush.msk.msra.mxu1 %vm2533_vm15, %v3087_v63 }
  0xa4   : > { %1013 = vmatpush.msra.mxu2 %v844_v43  ;;  %1301 = vmatpush.msk.msra.mxu3 %vm2569_vm12, %v3087_v63 }
  0xa5   : > { %909 = vmatpush.msra.mxu0 %v2671_v53  ;;  %1285 = vmatpush.msk.msra.mxu1 %vm2569_vm12, %v3087_v63 }
  0xa6   : > { %1017 = vmatpush.msra.mxu2 %v850_v11  ;;  %1302 = vmatpush.msk.msra.mxu3 %vm2603_vm9, %v3087_v63 }
  0xa7   : > { %912 = vmatpush.msra.mxu0 %v2691_v59  ;;  %1286 = vmatpush.msk.msra.mxu1 %vm2603_vm9, %v3087_v63 }
  0xa8   : > { %1021 = vmatpush.msra.mxu2 %v856_v40  ;;  %1303 = vmatpush.msk.msra.mxu3 %vm2638_vm2, %v3087_v63 }
  0xa9   : > { %915 = vmatmul.f32.vlgmr.msra.gmra.mxu0 %v2650_v55  ;;  %1023 = vmatmul.f32.vlgmr.msra.gmra.mxu2 %v2620_v50 }
  0xaa   : > { %1287 = vmatpush.msk.msra.mxu1 %vm2638_vm2, %v3087_v63  ;;  %1304 = vmatpush.msk.msra.mxu3 %vm2667_vm4, %v3087_v63 }
  0xab   : > { %1060 = vmatmul.f32.vlgmr.msra.gmra.mxu3 %v2620_v50 }
  0xac   : > { %1288 = vmatpush.msk.msra.mxu1 %vm2667_vm4, %v3087_v63 }
  0xad   : > { %954 = vmatmul.f32.vlgmr.msra.gmra.mxu1 %v2679_v49 }
  0xf7   : > { %v521_v4 = vpop.f32.mrf.mxu1 }
 0x101   : > { %v420_v12 = vpop.f32.mrf.mxu0  ;;  %v575_v33 = vpop.f32.mrf.mxu2 }
 0x102   : > { %v522_v2 = vadd.f32 %v521_v4, %v420_v12 }
 0x104   : > { %v576_v21 = vadd.f32 %v575_v33, %v522_v2 }
 0x107   : > { %v614_v24 = vpop.f32.mrf.mxu3 }
 0x108   : > { %v615_v6 = vadd.f32 %v614_v24, %v576_v21 }
 0x10b   : > { %v683_v34 = vpop.f32.mrf.mxu0 }
 0x10c   : > { %v684_v14 = vadd.f32 %v683_v34, %v615_v6 }
 0x10f   : > { %v720_v9 = vpop.f32.mrf.mxu1 }
 0x110   : > { %v721_v3 = vadd.f32 %v720_v9, %v684_v14 }
 0x112   : > { %1064 = vst [vmem:[%s151_s15] sm:$0xff] %v721_v3 }
 0x123   : > { %v761_v62 = vpop.f32.mrf.mxu2  ;;  %v862_v10 = vpop.f32.mrf.mxu3 }
 0x124   : > { %v863_v63 = vadd.f32 %v862_v10, %v761_v62 }
 0x126   : > { %v916_v41 = vpop.f32.mrf.mxu0 }
 0x127   : > { %v917_v8 = vadd.f32 %v916_v41, %v863_v63 }
 0x12a   : > { %v955_v51 = vpop.f32.mrf.mxu1 }
 0x12b   : > { %v956_v7 = vadd.f32 %v955_v51, %v917_v8 }
 0x12c   : > { %v1024_v30 = vpop.f32.mrf.mxu2 }
 0x12d   : > { %v1025_v57 = vadd.f32 %v1024_v30, %v956_v7 }
 0x12e   : > { %v1061_v28 = vpop.f32.mrf.mxu3 }
 0x12f   : > { %v1062_v61 = vadd.f32 %v1061_v28, %v1025_v57 }
 0x131   : > { %1065 = vst [vmem:[%s151_s15 + $0x8] sm:$0xff] %v1062_v61 }
 0x132   : > { %1432 = shalt.err (!%p1429_p13)
}
 0x133   : > { %1313 = dma.vmem_to_hbm [thread:$0]  (%p1552_p9), %s1083_s23, 256, %s1085_s24, %s1067_s25  }
 0x134 PF: > { %s1096_s3 = sand.u32 1, %s1467_s6   ;;  %p1320_p0 = pnand %p1171_p12, %p1559_p11 }
 0x135   : > { %s1097_s4 = scalar_lea.sflag [#allocation4], %s1096_s3 }
 0x136   : > { %p1321_p1 = pneg %p1320_p0 }
 0x138   : > { %1462 = dma.done.wait (%p1321_p1), %s1097_s4, 256  }
 0x139   : > { %1464 = vsyncadd (%p1321_p1), %s1097_s4, 4294967040  ;;  %s17_s11 = sadd.s32 1, %s1487_s11   ;;  %s3231_s6 = smov %s1471_s7 }
 0x13a   : > { %p14_p2 = scmp.ge.s32.totalorder %s17_s11, 4   ;;  %s3232_s7 = smov %s1475_s8 }
 0x13b   : > { %s3233_s8 = smov %s1557_s20  ;;  %s3234_s9 = smov %s1483_s10 }
 0x13c   : > { %s3235_s10 = smov %s3237_s14  ;;  %16 = sbr.rel (!%p14_p2) target bundleno = 6 (0x6), region = 69 }
 0x141   :  { %1103 = vsyncpa [#allocation3], 1 }
 0x142   :  { %1105 = vsyncpa [#allocation3 + $0x1], 1 }
 0x143   :  { %1106 = vsyncpa [#allocation4], 1 }
 0x144   :  { %1108 = vsyncpa [#allocation4 + $0x1], 1 }

</bundles_post_ra>
